<compile_context>
chip_gen: v6e
topology: v6e:2x2x1
jax: 0.10.0
libtpu: 0.0.40
codegen_flags: <defaults>
</compile_context>

<pallas_src>
import functools
import math

import jax
import jax.numpy as jnp
from jax import lax
from jax.experimental import pallas as pl
from jax.experimental.pallas import tpu as pltpu

# Deterministic parameter init: nn.PReLU() default (num_parameters=1, init=0.25)
# TODO(synk): a learned PReLU weight from a checkpoint is not supported here.
_PRELU_WEIGHT = 0.25

_SELU_ALPHA = 1.6732632423543772
_SELU_SCALE = 1.0507009873554805

_ELEMENTWISE_ACTS = (
    'elu', 'gelu', 'hardshrink', 'tanh', 'hardtanh', 'prelu', 'relu', 'relu6',
    'selu', 'leakyrelu', 'sigmoid', 'softplus', 'softshrink', 'softsign',
    'tanhshrink', 'logsigmoid', 'hsigmoid',
)
_SOFTMAX_ACTS = ('softmax', 'logsoftmax')
_ALL_ACTS = _ELEMENTWISE_ACTS + _SOFTMAX_ACTS

# Activations that are piecewise-linear (no transcendentals): safe to run in
# the native narrow dtype on v6e/v7x (bf16 VPU); v5e-only inputs are f32 anyway.
_PIECEWISE_LINEAR_ACTS = frozenset(
    {'relu', 'relu6', 'leakyrelu', 'hardtanh', 'prelu', 'hsigmoid',
     'hardshrink', 'softshrink'})
_TRANSCENDENTAL_ACTS = frozenset(
    {'elu', 'gelu', 'tanh', 'selu', 'sigmoid', 'softplus', 'softsign',
     'tanhshrink', 'logsigmoid'})

# Tiling knobs.
_EW_LANE = 1024                       # preferred lane width (lane-dense stores)
_EW_BLOCK_BYTES = 4 * 1024 * 1024     # ~4 MiB per elementwise block (dtype scaled)
_SM_BLOCK_F32_ELEMS = 512 * 1024      # ~2 MiB f32 per softmax block
_VMEM_LIMIT_BYTES = 48 * 1024 * 1024  # < v7x's 64 MiB physical, > 16/32 MiB defaults


def _cdiv(a, b):
    return -(-a // b)


def _round_up(a, m):
    return _cdiv(a, m) * m


def _apply_act(x, act):
    """Elementwise activation math (runs inside the Pallas kernel)."""
    orig_dtype = x.dtype
    if act in _PIECEWISE_LINEAR_ACTS and jnp.issubdtype(orig_dtype, jnp.floating):
        f = x                                   # stay in bf16/f16/f32 (VPU-native)
    else:
        f = x.astype(jnp.float32)
    if act == 'elu':                                       # nn.ELU (alpha=1)
        y = jnp.where(f > 0, f, jnp.expm1(f))
    elif act == 'gelu':                                    # nn.GELU (exact, erf)
        y = 0.5 * f * (1.0 + lax.erf(f * (1.0 / math.sqrt(2.0))))
    elif act == 'hardshrink':                              # nn.Hardshrink (lambda=0.5)
        y = jnp.where(jnp.abs(f) > 0.5, f, 0.0)
    elif act == 'tanh':                                    # nn.Tanh
        y = jnp.tanh(f)
    elif act == 'hardtanh':                                # nn.Hardtanh (-1, 1)
        y = jnp.clip(f, -1.0, 1.0)
    elif act == 'prelu':                                   # nn.PReLU (scalar w=0.25)
        y = jnp.maximum(f, 0.0) + _PRELU_WEIGHT * jnp.minimum(f, 0.0)
    elif act == 'relu':                                    # nn.ReLU
        y = jnp.maximum(f, 0.0)
    elif act == 'relu6':                                   # nn.ReLU6
        y = jnp.clip(f, 0.0, 6.0)
    elif act == 'selu':                                    # nn.SELU
        y = _SELU_SCALE * (jnp.maximum(f, 0.0)
                           + jnp.minimum(_SELU_ALPHA * jnp.expm1(f), 0.0))
    elif act == 'leakyrelu':                               # nn.LeakyReLU (slope=0.01)
        y = jnp.where(f >= 0, f, 0.01 * f)
    elif act == 'sigmoid':                                 # nn.Sigmoid
        y = 1.0 / (1.0 + jnp.exp(-f))
    elif act == 'softplus':                                # nn.Softplus (beta=1, thr=20)
        y = jnp.where(f > 20.0, f, jnp.log1p(jnp.exp(jnp.minimum(f, 20.0))))
    elif act == 'softshrink':                              # nn.Softshrink (lambda=0.5)
        y = jnp.where(f > 0.5, f - 0.5, jnp.where(f < -0.5, f + 0.5, 0.0))
    elif act == 'softsign':                                # nn.Softsign
        y = f / (1.0 + jnp.abs(f))
    elif act == 'tanhshrink':                              # nn.Tanhshrink
        y = f - jnp.tanh(f)
    elif act == 'logsigmoid':                              # nn.LogSigmoid (stable)
        y = jnp.minimum(f, 0.0) - jnp.log1p(jnp.exp(-jnp.abs(f)))
    elif act == 'hsigmoid':                                # nn.Hardsigmoid
        y = jnp.clip(f / 6.0 + 0.5, 0.0, 1.0)
    else:
        raise KeyError(act)
    return y.astype(orig_dtype)


# ----------------------------- kernels -------------------------------------

def _elementwise_kernel(x_ref, o_ref, *, act):
    o_ref[...] = _apply_act(x_ref[...], act)


def _softmax_channel_kernel(x_ref, o_ref, *, log):
    # block (1, C, tile_l): reduce over channels (sublane-ish axis),
    # spatial dims stay lane-dense.
    x = x_ref[...].astype(jnp.float32)
    m = jnp.max(x, axis=1, keepdims=True)
    e = jnp.exp(x - m)
    s = jnp.sum(e, axis=1, keepdims=True)
    if log:
        y = (x - m) - jnp.log(s)
    else:
        y = e * (1.0 / s)          # divide only the reduced row, multiply the rest
    o_ref[...] = y.astype(o_ref.dtype)


def _softmax_lane_kernel(x_ref, o_ref, *, log):
    # block (tile_m, C): softmax over the last (lane) axis.
    x = x_ref[...].astype(jnp.float32)
    m = jnp.max(x, axis=-1, keepdims=True)
    e = jnp.exp(x - m)
    s = jnp.sum(e, axis=-1, keepdims=True)
    if log:
        y = (x - m) - jnp.log(s)
    else:
        y = e * (1.0 / s)
    o_ref[...] = y.astype(o_ref.dtype)


def _softmax_sublane_kernel(x_ref, o_ref, *, log):
    # block (C, tile_b): softmax over sublanes, batch is lane-dense
    # (used when the class count C < 128 but the batch is large).
    x = x_ref[...].astype(jnp.float32)
    m = jnp.max(x, axis=0, keepdims=True)
    e = jnp.exp(x - m)
    s = jnp.sum(e, axis=0, keepdims=True)
    if log:
        y = (x - m) - jnp.log(s)
    else:
        y = e * (1.0 / s)
    o_ref[...] = y.astype(o_ref.dtype)


# ----------------------------- wrappers ------------------------------------

def _ew_cost(total, itemsize, act):
    return pl.CostEstimate(
        flops=2 * total,
        transcendentals=total if act in _TRANSCENDENTAL_ACTS else 0,
        bytes_accessed=2 * total * itemsize)


def _sm_cost(total, itemsize, log):
    return pl.CostEstimate(
        flops=5 * total,
        transcendentals=(2 if log else 1) * total,
        bytes_accessed=2 * total * itemsize)


def _compiler_params(n_axes):
    return pltpu.CompilerParams(
        dimension_semantics=("parallel",) * n_axes,
        vmem_limit_bytes=_VMEM_LIMIT_BYTES)


def _elementwise_pallas(x, act):
    orig_shape = x.shape
    total = int(x.size)
    if total == 0:
        return x
    dtype = x.dtype
    itemsize = dtype.itemsize

    # Pick a lane width that divides the flattened size so no pad/slice pass
    # is needed (lane-dense, full-width stores).
    W = None
    for cand in (_EW_LANE, 512, 256, 128):
        if total % cand == 0:
            W = cand
            break
    flat = x.reshape(-1)
    pad = 0
    if W is None:
        # TODO(synk): sizes not a multiple of 128 still pay one pad+slice pass.
        W = 128
        pad = _round_up(total, W) - total
        flat = jnp.pad(flat, (0, pad))
    rows = (total + pad) // W
    x2 = flat.reshape(rows, W)

    # ~4 MiB blocks (dtype-scaled); guarantee >= 2 grid steps when possible so
    # v7x's two TensorCores can both work. Ragged row edges are masked by Pallas.
    budget_rows = max(8, (_EW_BLOCK_BYTES // (W * itemsize)) // 8 * 8)
    if rows < 16:
        tile_m = rows                      # single full block (dim == full extent)
    else:
        tile_m = min(budget_rows, _round_up(_cdiv(rows, 2), 8))
    grid = (_cdiv(rows, tile_m),)

    kernel = functools.partial(_elementwise_kernel, act=act)
    out = pl.pallas_call(
        kernel,
        out_shape=jax.ShapeDtypeStruct((rows, W), dtype),
        grid=grid,
        in_specs=[pl.BlockSpec((tile_m, W), lambda i: (i, 0))],
        out_specs=pl.BlockSpec((tile_m, W), lambda i: (i, 0)),
        compiler_params=_compiler_params(1),
        cost_estimate=_ew_cost(total, itemsize, act),
    )(x2)

    if pad:
        return out.reshape(-1)[:total].reshape(orig_shape)
    return out.reshape(orig_shape)


def _softmax_pallas(x, log):
    # nn.Softmax()/nn.LogSoftmax() with dim=None: dim = 0 if ndim in (0,1,3) else 1
    if x.ndim == 0:
        return jnp.zeros_like(x) if log else jnp.ones_like(x)
    if x.size == 0:
        return x
    dim = 0 if x.ndim in (1, 3) else 1
    shape = x.shape
    C = shape[dim]
    B = math.prod(shape[:dim]) if dim > 0 else 1
    L = math.prod(shape[dim + 1:]) if dim + 1 <= x.ndim else 1
    dtype = x.dtype
    itemsize = dtype.itemsize
    total = int(x.size)
    cost = _sm_cost(total, itemsize, log)

    if L == 1:
        # Softmax axis is (effectively) the last axis.
        x2 = x.reshape(B, C)

        if C < 128 and B >= 256:
            # Few classes, large batch: re-layout so batch is lane-dense and
            # the reduction runs over sublanes (avoids masked partial stores).
            xt = x2.T                                            # (C, B)
            budget_b = max(128, (_SM_BLOCK_F32_ELEMS // C) // 128 * 128)
            cap_b = B if B % 128 == 0 else (B // 128) * 128
            tile_b = min(budget_b, cap_b)
            if _cdiv(B, tile_b) == 1:
                tile_b = min(tile_b, max(128, _round_up(_cdiv(B, 2), 128)))
            kernel = functools.partial(_softmax_sublane_kernel, log=log)
            out_t = pl.pallas_call(
                kernel,
                out_shape=jax.ShapeDtypeStruct((C, B), dtype),
                grid=(_cdiv(B, tile_b),),
                in_specs=[pl.BlockSpec((C, tile_b), lambda i: (0, i))],
                out_specs=pl.BlockSpec((C, tile_b), lambda i: (0, i)),
                compiler_params=_compiler_params(1),
                cost_estimate=cost,
            )(xt)
            return out_t.T.reshape(shape)

        # Generic last-axis softmax: rows on sublanes, class axis on lanes.
        budget_m = max(8, (_SM_BLOCK_F32_ELEMS // C) // 8 * 8)
        if B < 16:
            tile_m = B
        else:
            tile_m = min(budget_m, _round_up(_cdiv(B, 2), 8))
        kernel = functools.partial(_softmax_lane_kernel, log=log)
        out = pl.pallas_call(
            kernel,
            out_shape=jax.ShapeDtypeStruct((B, C), dtype),
            grid=(_cdiv(B, tile_m),),
            in_specs=[pl.BlockSpec((tile_m, C), lambda i: (i, 0))],
            out_specs=pl.BlockSpec((tile_m, C), lambda i: (i, 0)),
            compiler_params=_compiler_params(1),
            cost_estimate=cost,
        )(x2)
        return out.reshape(shape)

    # General case (e.g. NCHW with dim=1, CHW with dim=0): channels on the
    # sublane-ish axis, trailing spatial dims lane-dense. No padding: ragged
    # lane edges are handled by Pallas' uneven-grid masking.
    x3 = x.reshape(B, C, L)
    if L < 128:
        tile_l = L
    else:
        budget_l = max(128, (_SM_BLOCK_F32_ELEMS // C) // 128 * 128)
        cap_l = L if L % 128 == 0 else (L // 128) * 128
        tile_l = min(budget_l, cap_l)
        if B == 1 and L >= 256:
            # keep >= 2 grid steps so both v7x TensorCores get work
            tile_l = min(tile_l, max(128, _round_up(_cdiv(L, 2), 128)))
    kernel = functools.partial(_softmax_channel_kernel, log=log)
    out = pl.pallas_call(
        kernel,
        out_shape=jax.ShapeDtypeStruct((B, C, L), dtype),
        grid=(B, _cdiv(L, tile_l)),
        in_specs=[pl.BlockSpec((1, C, tile_l), lambda b, l: (b, 0, l))],
        out_specs=pl.BlockSpec((1, C, tile_l), lambda b, l: (b, 0, l)),
        compiler_params=_compiler_params(2),
        cost_estimate=cost,
    )(x3)
    return out.reshape(shape)


class Activation:
    """JAX/Pallas port of the PyTorch Activation wrapper."""

    def __init__(self, act=None):
        self._act = act
        if act is not None and act not in _ALL_ACTS:
            raise KeyError('{} does not exist in the current {}'.format(
                act, list(_ALL_ACTS)))

    def __call__(self, x):
        if self._act is None:
            return x
        if self._act in _SOFTMAX_ACTS:
            return _softmax_pallas(x, log=(self._act == 'logsoftmax'))
        return _elementwise_pallas(x, self._act)


# ------------------------------- demo --------------------------------------

if __name__ == "__main__":
    key = jax.random.PRNGKey(0)
    k0, k1 = jax.random.split(key)
    x = jax.random.normal(k0, (2, 4, 16, 16), dtype=jnp.float32)   # NCHW
    logits = jax.random.normal(k1, (256, 10), dtype=jnp.float32)   # lane-dense path

    acts_to_test = [None, 'relu', 'gelu', 'sigmoid', 'prelu', 'elu', 'relu6',
                    'leakyrelu', 'hsigmoid', 'tanh', 'softplus', 'logsigmoid',
                    'softmax', 'logsoftmax']
    outs = {}
    for a in acts_to_test:
        y = Activation(a)(x)
        jax.block_until_ready(y)
        outs[a] = y

    # 2D logits exercise the C<128 lane-dense (transposed) softmax path
    sm_logits = Activation('softmax')(logits)
    lsm_logits = Activation('logsoftmax')(logits)
    jax.block_until_ready(sm_logits)
    jax.block_until_ready(lsm_logits)

    # bf16 piecewise-linear path (no f32 upcast)
    x_bf16 = x.astype(jnp.bfloat16)
    relu_bf16 = Activation('relu')(x_bf16)
    jax.block_until_ready(relu_bf16)

    # light sanity checks against plain-JAX references
    assert jnp.allclose(outs[None], x)
    assert jnp.allclose(outs['relu'], jnp.maximum(x, 0.0))
    assert jnp.allclose(outs['sigmoid'], jax.nn.sigmoid(x), atol=1e-6)
    assert jnp.allclose(outs['gelu'], jax.nn.gelu(x, approximate=False), atol=1e-5)
    assert jnp.allclose(outs['softmax'], jax.nn.softmax(x, axis=1), atol=1e-6)
    assert jnp.allclose(outs['logsoftmax'], jax.nn.log_softmax(x, axis=1), atol=1e-5)
    assert jnp.allclose(outs['prelu'],
                        jnp.where(x >= 0, x, _PRELU_WEIGHT * x), atol=1e-6)
    assert jnp.allclose(sm_logits, jax.nn.softmax(logits, axis=1), atol=1e-6)
    assert jnp.allclose(lsm_logits, jax.nn.log_softmax(logits, axis=1), atol=1e-5)
    assert jnp.allclose(relu_bf16, jnp.maximum(x_bf16, 0))

    print("KERNEL_OK")
</pallas_src>

<mosaic_0001>
module attributes {stable_mosaic.version = 11 : i64} {
  func.func @_elementwise_kernel(%arg0: i32, %arg1: memref<2x1024xf32, #tpu.memory_space<vmem>>, %arg2: memref<2x1024xf32, #tpu.memory_space<vmem>>) attributes {dimension_semantics = [#tpu.dimension_semantics<parallel>], iteration_bounds = array<i64: 1>, scalar_prefetch = 0 : i64, scratch_operands = 0 : i64, tpu.core_type = #tpu.core_type<tc>, window_params = [{transform_indices = @transform_0, window_bounds = array<i64: 2, 1024>}, {transform_indices = @transform_1, window_bounds = array<i64: 2, 1024>}]} {
    %c0 = arith.constant 0 : index
    %c0_0 = arith.constant 0 : index
    %0 = vector.load %arg1[%c0, %c0_0] : memref<2x1024xf32, #tpu.memory_space<vmem>>, vector<2x1024xf32>
    %cst = arith.constant 0.000000e+00 : f32
    %1 = vector.broadcast %cst : f32 to vector<2x1024xf32>
    %2 = arith.maximumf %0, %1 : vector<2x1024xf32>
    %c0_1 = arith.constant 0 : index
    %c0_2 = arith.constant 0 : index
    %3 = vector.load %arg2[%c0_1, %c0_2] : memref<2x1024xf32, #tpu.memory_space<vmem>>, vector<2x1024xf32>
    tpu.vector_store %arg2[%c0_1, %c0_2], %2 {strides = array<i32>} : memref<2x1024xf32, #tpu.memory_space<vmem>>, vector<2x1024xf32>,
    return
  }
  func.func @transform_0(%arg0: i32) -> (i32, i32) {
    %c0_i32 = arith.constant 0 : i32
    %c0_i32_0 = arith.constant 0 : i32
    return %arg0, %c0_i32 : i32, i32
  }
  func.func @transform_1(%arg0: i32) -> (i32, i32) {
    %c0_i32 = arith.constant 0 : i32
    %c0_i32_0 = arith.constant 0 : i32
    return %arg0, %c0_i32 : i32, i32
  }
}

</mosaic_0001>

<bundles_post_ra>
// kernel: tpu_custom_call.1
= control target key start
LH: loop header
LB: loop body
LE: loop exit
PB: predicated region body
PF: predicated region fallthrough
CT: control target
= control target key end

     0   :  { %6 = vsyncpa [#allocation3], 0  ;;  %s106_s0 = inlined_call_operand.hbm [shape: f32[2,1024], index: 0, kind: input, shape index: {}]   ;;  %s107_s1 = inlined_call_operand.hbm [shape: f32[2,1024], index: 1, kind: output, shape index: {}]  }
   0x1   :  { %7 = vsyncpa [#allocation4], 0  ;;  %s88_s6 = smov [#allocation2]  }
   0x2   :  { %s14_s7 = sshll.u32 %s88_s6, 4  ;;  %s15_s7 = int_to_ptr.vmem [resolvable:$true] %s14_s7 }
   0x3   :  { %s52_s8 = scalar_lea.vmem %s15_s7, 256  ;;  %p57_p1 = scmp.lt.s32.totalorder %s15_s7, %s15_s7 }
   0x4   :  { %p53_p0 = scmp.ne.s32.totalorder %s15_s7, %s52_s8  ;;  %p58_p2 = scmp.lt.s32.totalorder %s52_s8, %s52_s8 }
   0x6   :  { %p59_p3 = por %p58_p2, %p57_p1 }
   0x8   :  { %p60_p4 = pnand %p59_p3, %p53_p0 }
   0xa   :  { %63 = shalt.err (!%p60_p4)
}
   0xb   :  { %17 = dma.hbm_to_vmem [thread:$0]  %s106_s0, 256, %s15_s7, [#allocation3]  }
   0xc   :  { %84 = dma.done.wait [#allocation3], 256  }
   0xd   :  { %85 = vsyncadd [#allocation3], 4294967040  ;;  %s89_s11 = smov [#allocation5]   ;;  %v21_v0 = vld [vmem:[#allocation2] sm:$0xff]  ;;  %v22_v1 = vld [vmem:[#allocation2 + $0x8] sm:$0xff] }
   0xe   :  { %s33_s12 = sshll.u32 %s89_s11, 4  ;;  %v23_v2 = vmax.f32 %v21_v0, 0.0  ;;  %v24_v3 = vmax.f32 %v22_v1, 0.0  ;;  %s34_s12 = int_to_ptr.vmem [resolvable:$true] %s33_s12 }
   0xf   :  { %s64_s13 = scalar_lea.vmem %s34_s12, 256  ;;  %p69_p6 = scmp.lt.s32.totalorder %s34_s12, %s34_s12 }
  0x10   :  { %25 = vst [vmem:[#allocation5] sm:$0xff] %v23_v2  ;;  %26 = vst [vmem:[#allocation5 + $0x8] sm:$0xff] %v24_v3  ;;  %p65_p5 = scmp.ne.s32.totalorder %s34_s12, %s64_s13  ;;  %p70_p7 = scmp.lt.s32.totalorder %s64_s13, %s64_s13 }
  0x12   :  { %p71_p8 = por %p70_p7, %p69_p6 }
  0x14   :  { %p72_p9 = pnand %p71_p8, %p65_p5 }
  0x16   :  { %75 = shalt.err (!%p72_p9)
}
  0x17   :  { %36 = dma.vmem_to_hbm [thread:$0]  %s34_s12, 256, %s107_s1, [#allocation4]  }
  0x18   :  { %86 = dma.done.wait [#allocation4], 256  }
  0x19   :  { %87 = vsyncadd [#allocation4], 4294967040 }
  0x1a   :  { %40 = vsyncpa [#allocation3], 1 }
  0x1b   :  { %41 = vsyncpa [#allocation4], 1 }

</bundles_post_ra>
